<compile_context>
chip_gen: v6e
topology: v6e:2x2x1
jax: 0.10.0
libtpu: 0.0.40
codegen_flags: <defaults>
</compile_context>

<pallas_src>
import math

import jax
import jax.numpy as jnp
from jax.experimental import pallas as pl
from jax.experimental.pallas import tpu as pltpu


def _linear_embedding_kernel(x_ref, wt_ref, b_ref, o_ref):
    # x_ref : (tm, K)   token rows (K = inp_size, fully resident -> no ragged K)
    # wt_ref: (K, tn)   W^T tile, pre-scaled by sqrt(d_model) at init time
    # b_ref : (1, tn)   bias tile, pre-scaled by sqrt(d_model) at init time
    # o_ref : (tm, tn)  output tile
    acc = jnp.dot(x_ref[...], wt_ref[...], preferred_element_type=jnp.float32)
    acc = acc + b_ref[...].astype(jnp.float32)
    o_ref[...] = acc.astype(o_ref.dtype)


def _vmem_budget_bytes():
    """Generation-aware VMEM budget (~25% headroom for Mosaic internals)."""
    try:
        cap = pltpu.get_tpu_info().vmem_capacity_bytes
    except Exception:
        cap = 64 * 1024 * 1024  # conservative default = v7x per-TC physical VMEM
    return int(cap * 0.75)


def linear_embedding(x, w_t, b):
    """y = x @ w_t + b, where w_t / b already carry the sqrt(d_model) scale.

    x   : [B, S, inp_size]
    w_t : [inp_size, d_model]   (nn.Linear weight, transposed + scaled at init)
    b   : [d_model]             (bias, scaled at init)
    """
    B, S, K = x.shape
    Kw, N = w_t.shape
    assert Kw == K and b.shape == (N,)

    M = B * S
    x2 = x.reshape(M, K)
    b2 = b.reshape(1, N)

    es = 4  # f32 worst case for footprint estimates
    budget = _vmem_budget_bytes()
    out_bytes = M * N * jnp.dtype(x.dtype).itemsize

    # ------------------------------------------------------------------
    # Path A (normal LinearEmbedding case): W^T + bias fully VMEM-resident,
    # 1-D grid over M only.
    # ------------------------------------------------------------------
    def resident_bytes(tm_):
        # double-buffered x/out tiles + single-resident weight/bias (x2 slack)
        return 2 * tm_ * (K + N) * es + 2 * (K * N + N) * es

    tm = None
    for cand in (1024, 512, 256, 128, 64, 32, 16, 8):
        if resident_bytes(min(cand, M)) <= budget:
            tm = cand
            break

    if tm is not None:
        if M <= tm:
            tm = M  # full extent: no (8,) sublane constraint on the block
        else:
            # >= 2 roughly balanced M blocks so v7x's two TensorCores both work
            half = ((pl.cdiv(M, 2) + 7) // 8) * 8
            tm = min(tm, max(8, half))

        grid = (pl.cdiv(M, tm),)
        cost = pl.CostEstimate(
            flops=2 * M * K * N,
            transcendentals=0,
            bytes_accessed=int(x2.nbytes + w_t.nbytes + b.nbytes + out_bytes),
        )
        vmem_limit = int(min(max(2 * resident_bytes(tm), 32 * 1024 * 1024), budget))

        out = pl.pallas_call(
            _linear_embedding_kernel,
            out_shape=jax.ShapeDtypeStruct((M, N), x.dtype),
            grid_spec=pltpu.PrefetchScalarGridSpec(
                num_scalar_prefetch=0,
                grid=grid,
                in_specs=[
                    pl.BlockSpec((tm, K), lambda i: (i, 0)),  # x rows (streamed)
                    pl.BlockSpec((K, N), lambda i: (0, 0)),   # W^T (resident, 1 fetch)
                    pl.BlockSpec((1, N), lambda i: (0, 0)),   # bias (resident, 1 fetch)
                ],
                out_specs=pl.BlockSpec((tm, N), lambda i: (i, 0)),
            ),
            compiler_params=pltpu.CompilerParams(
                dimension_semantics=("parallel",),
                vmem_limit_bytes=vmem_limit,
            ),
            cost_estimate=cost,
        )(x2, w_t, b2)
        return out.reshape(B, S, N)

    # ------------------------------------------------------------------
    # Path B (large K*N, weight cannot stay resident): 2-D grid.  Pick the
    # axis order that re-streams the smaller operand.
    # ------------------------------------------------------------------
    # tn: lane-dense (multiple of 128) and dividing N when possible.
    tn = min(256, N)
    if N % 128 == 0 and N > 128:
        tn = min(256, N)
        while N % tn != 0:
            tn -= 128
    tm = min(512, M)

    def tile_bytes(tm_, tn_):
        return 2 * (tm_ * K + K * tn_ + tn_ + tm_ * tn_) * es

    while tm > 8 and tile_bytes(tm, tn) > budget:
        tm //= 2
    if tm < M:
        tm = max(8, (tm // 8) * 8)
    # TODO(synk): for K so large that even tm=8 does not fit the budget, add a
    # K reduction grid axis ("arbitrary", last) with an f32 VMEM accumulator.

    gm, gn = pl.cdiv(M, tm), pl.cdiv(N, tn)
    # M-outer: W^T re-streamed gm times, x read once.
    # N-outer: x re-streamed gn times, W^T read once.
    m_outer = (gm - 1) * K * N <= (gn - 1) * M * K

    if m_outer:
        grid = (gm, gn)
        in_specs = [
            pl.BlockSpec((tm, K), lambda i, j: (i, 0)),
            pl.BlockSpec((K, tn), lambda i, j: (0, j)),
            pl.BlockSpec((1, tn), lambda i, j: (0, j)),
        ]
        out_specs = pl.BlockSpec((tm, tn), lambda i, j: (i, j))
        bytes_rd = (M * K * x2.dtype.itemsize
                    + gm * K * N * w_t.dtype.itemsize
                    + gm * N * b.dtype.itemsize)
    else:
        grid = (gn, gm)
        in_specs = [
            pl.BlockSpec((tm, K), lambda j, i: (i, 0)),
            pl.BlockSpec((K, tn), lambda j, i: (0, j)),
            pl.BlockSpec((1, tn), lambda j, i: (0, j)),
        ]
        out_specs = pl.BlockSpec((tm, tn), lambda j, i: (i, j))
        bytes_rd = (gn * M * K * x2.dtype.itemsize
                    + K * N * w_t.dtype.itemsize
                    + gn * N * b.dtype.itemsize)

    cost = pl.CostEstimate(
        flops=2 * M * K * N,
        transcendentals=0,
        bytes_accessed=int(bytes_rd + out_bytes),
    )
    vmem_limit = int(min(max(3 * tile_bytes(tm, tn), 32 * 1024 * 1024), budget))

    out = pl.pallas_call(
        _linear_embedding_kernel,
        out_shape=jax.ShapeDtypeStruct((M, N), x.dtype),
        grid_spec=pltpu.PrefetchScalarGridSpec(
            num_scalar_prefetch=0,
            grid=grid,
            in_specs=in_specs,
            out_specs=out_specs,
        ),
        compiler_params=pltpu.CompilerParams(
            dimension_semantics=("parallel", "parallel"),
            vmem_limit_bytes=vmem_limit,
        ),
        cost_estimate=cost,
    )(x2, w_t, b2)
    return out.reshape(B, S, N)


def init_linear_embedding_params(key, inp_size, d_model, dtype=jnp.float32):
    """Mimics nn.Linear init; folds the sqrt(d_model) scale and the transpose
    into the stored parameters ONCE so the per-call path is a pure GEMM+bias."""
    kw, kb = jax.random.split(key)
    bound = 1.0 / math.sqrt(inp_size)
    w = jax.random.uniform(kw, (d_model, inp_size), dtype, -bound, bound)
    b = jax.random.uniform(kb, (d_model,), dtype, -bound, bound)
    scale = math.sqrt(d_model)
    w_t_scaled = jnp.transpose(w) * scale  # [inp_size, d_model]
    b_scaled = b * scale
    return w, b, w_t_scaled, b_scaled


if __name__ == "__main__":
    # Shapes consistent with the module's forward:
    # x: [batch=2, seq=8, inp_size=4] -> out: [2, 8, d_model=32]
    batch, seq, inp_size, d_model = 2, 8, 4, 32

    key = jax.random.PRNGKey(0)
    kx, kp = jax.random.split(key)

    x = jax.random.normal(kx, (batch, seq, inp_size), dtype=jnp.float32)
    w, b, w_t_scaled, b_scaled = init_linear_embedding_params(kp, inp_size, d_model)

    y = linear_embedding(x, w_t_scaled, b_scaled)
    y = jax.block_until_ready(y)

    # Reference check in plain JAX (original, un-folded parameters).
    y_ref = (x @ w.T + b) * math.sqrt(d_model)
    assert y.shape == (batch, seq, d_model)
    assert jnp.allclose(y, y_ref, atol=1e-5, rtol=1e-5)

    print("KERNEL_OK")
</pallas_src>

<mosaic_0001>
module attributes {stable_mosaic.version = 11 : i64} {
  func.func @_linear_embedding_kernel(%arg0: i32, %arg1: memref<16x4xf32, #tpu.memory_space<vmem>>, %arg2: memref<4x32xf32, #tpu.memory_space<vmem>>, %arg3: memref<1x32xf32, #tpu.memory_space<vmem>>, %arg4: memref<16x32xf32, #tpu.memory_space<vmem>>) attributes {dimension_semantics = [#tpu.dimension_semantics<parallel>], iteration_bounds = array<i64: 1>, scalar_prefetch = 0 : i64, scratch_operands = 0 : i64, tpu.core_type = #tpu.core_type<tc>, window_params = [{transform_indices = @transform_0, window_bounds = array<i64: 16, 4>}, {pipeline_mode = #tpu.pipeline_mode<synchronous>, transform_indices = @transform_1, window_bounds = array<i64: 4, 32>}, {pipeline_mode = #tpu.pipeline_mode<synchronous>, transform_indices = @transform_2, window_bounds = array<i64: 1, 32>}, {transform_indices = @transform_3, window_bounds = array<i64: 16, 32>}]} {
    %c0 = arith.constant 0 : index
    %c0_0 = arith.constant 0 : index
    %0 = vector.load %arg1[%c0, %c0_0] : memref<16x4xf32, #tpu.memory_space<vmem>>, vector<16x4xf32>
    %c0_1 = arith.constant 0 : index
    %c0_2 = arith.constant 0 : index
    %1 = vector.load %arg2[%c0_1, %c0_2] : memref<4x32xf32, #tpu.memory_space<vmem>>, vector<4x32xf32>
    %cst = arith.constant dense<0.000000e+00> : vector<16x32xf32>
    %2 = tpu.matmul %0, %1, %cst {dimension_numbers = #tpu.dot_dimension_numbers<[1], [0], [0], [1], [0, 0, 1, 1], [], []>} : vector<16x4xf32>, vector<4x32xf32>, vector<16x32xf32> -> vector<16x32xf32>
    %c0_3 = arith.constant 0 : index
    %c0_4 = arith.constant 0 : index
    %3 = vector.load %arg3[%c0_3, %c0_4] : memref<1x32xf32, #tpu.memory_space<vmem>>, vector<1x32xf32>
    %4 = vector.broadcast %3 : vector<1x32xf32> to vector<16x32xf32>
    %5 = arith.addf %2, %4 : vector<16x32xf32>
    %c0_5 = arith.constant 0 : index
    %c0_6 = arith.constant 0 : index
    %6 = vector.load %arg4[%c0_5, %c0_6] : memref<16x32xf32, #tpu.memory_space<vmem>>, vector<16x32xf32>
    tpu.vector_store %arg4[%c0_5, %c0_6], %5 {strides = array<i32>} : memref<16x32xf32, #tpu.memory_space<vmem>>, vector<16x32xf32>,
    return
  }
  func.func @transform_0(%arg0: i32) -> (i32, i32) {
    %c0_i32 = arith.constant 0 : i32
    %c0_i32_0 = arith.constant 0 : i32
    return %arg0, %c0_i32 : i32, i32
  }
  func.func @transform_1(%arg0: i32) -> (i32, i32) {
    %c0_i32 = arith.constant 0 : i32
    %c0_i32_0 = arith.constant 0 : i32
    %c0_i32_1 = arith.constant 0 : i32
    return %c0_i32, %c0_i32_0 : i32, i32
  }
  func.func @transform_2(%arg0: i32) -> (i32, i32) {
    %c0_i32 = arith.constant 0 : i32
    %c0_i32_0 = arith.constant 0 : i32
    %c0_i32_1 = arith.constant 0 : i32
    return %c0_i32, %c0_i32_0 : i32, i32
  }
  func.func @transform_3(%arg0: i32) -> (i32, i32) {
    %c0_i32 = arith.constant 0 : i32
    %c0_i32_0 = arith.constant 0 : i32
    return %arg0, %c0_i32 : i32, i32
  }
}

</mosaic_0001>

<bundles_post_ra>
// kernel: tpu_custom_call.1
= control target key start
LH: loop header
LB: loop body
LE: loop exit
PB: predicated region body
PF: predicated region fallthrough
CT: control target
= control target key end

     0   :  { %vm32_vm0 = vcmask 1043456   ;;  %vm25_vm1 = vcmask 31744   ;;  %s205_s0 = inlined_call_operand.vmem [shape: f32[16,4], index: 0, kind: input, shape index: {}]   ;;  %s206_s1 = inlined_call_operand.vmem [shape: f32[4,32], index: 1, kind: input, shape index: {}]   ;;  %s207_s2 = inlined_call_operand.vmem [shape: f32[1,32], index: 2, kind: input, shape index: {}]   ;;  %s208_s3 = inlined_call_operand.hbm [shape: f32[16,32], index: 3, kind: output, shape index: {}]  }
   0x1   :  { %v17_v0 = vld [vmem:[%s206_s1] sm:$0xf]  ;;  %v16_v2 = vld [vmem:[%s205_s0 + $0x8] sm:$0xff] }
   0x2   :  { %v15_v1 = vld [vmem:[%s205_s0] sm:$0xff]  ;;  %137 = vmatprep.subr.msk.mxu0 %vm32_vm0, %v17_v0 }
   0x3   :  { %139 = vmatprep.mubr.msk.f32.mxu0 %vm25_vm1, %v15_v1 }
   0x4   :  { %8 = vsyncpa [#allocation3], 0  ;;  %138 = vmatpush3.msk.msra.mxu0 %vm32_vm0, %v17_v0  ;;  %v130_v3 = vld [vmem:[%s207_s2] ss:$0 sm:$0xff]  ;;  %s167_s1 = smov [#allocation2]   ;;  %vm111_vm2 = vcmask 261120  }
   0x5   :  { %140 = vmatmul.mubr.msk.f32.vlgmr.msra.gmra.mxu0 %vm25_vm1, %v16_v2  ;;  %s119_s20 = sshll.u32 %s167_s1, 4  ;;  %s120_s20 = int_to_ptr.vmem [resolvable:$true] %s119_s20 }
   0x6   :  { %s145_s0 = scalar_lea.vmem %s120_s20, 256  ;;  %p150_p1 = scmp.lt.s32.totalorder %s120_s20, %s120_s20 }
   0x7   :  { %p146_p0 = scmp.ne.s32.totalorder %s120_s20, %s145_s0  ;;  %p151_p2 = scmp.lt.s32.totalorder %s145_s0, %s145_s0 }
   0x9   :  { %p152_p3 = por %p151_p2, %p150_p1 }
   0xb   :  { %p153_p4 = pnand %p152_p3, %p146_p0 }
  0xc5   :  { %v141_v4 = vpop.f32.mrf.mxu0 }
  0xc6   :  { %v108_v5 = vadd.f32 %v141_v4, %v130_v3 }
  0xc7   :  { %v102_v6 = vpop.f32.mrf.mxu0 }
  0xc8   :  { %113 = vst.msk [vmem:[#allocation2 + $0x8] sm:$0xff] %vm111_vm2, %v108_v5  ;;  %v103_v7 = vadd.f32 %v130_v3, %v102_v6 }
  0xca   :  { %112 = vst.msk [vmem:[#allocation2] sm:$0xff] %vm111_vm2, %v103_v7 }
  0xcb   :  { %156 = shalt.err (!%p153_p4)
}
  0xcc   :  { %s168_s21 = smov 128   ;;  %s169_s22 = smov 8  }
  0xcd   :  { %125 = dma.vmem_to_hbm [thread:$0]  %s120_s20, 256, %s208_s3, [#allocation3], %s168_s21, %s168_s21, %s169_s22  }
  0xce   :  { %165 = dma.done.wait [#allocation3], 256  }
  0xcf   :  { %166 = vsyncadd [#allocation3], 4294967040 }
  0xd0   :  { %129 = vsyncpa [#allocation3], 1 }

</bundles_post_ra>
